<compile_context>
chip_gen: v7x
topology: tpu7x:2x2x1
jax: 0.10.0
libtpu: 0.0.40
codegen_flags: <defaults>
</compile_context>

<pallas_src>
import numpy as np
import jax
import jax.numpy as jnp
from jax import lax
from jax.experimental import pallas as pl
from jax.experimental.pallas import tpu as pltpu

# ----------------------------- config ---------------------------------------
B = 2            # batch
C = 3            # channels (CLIP mean/std are 3-channel)
H = W = 16       # input spatial size
S = 32           # synthetic "self.size" (real ViT-L/14 uses 224; kept small)
SEQ = 8          # text sequence length
VOCAB = 64       # synthetic vocab
EMB = 32         # text embedding width
D = 32           # true synthetic feature dim (real CLIP: 768)
DP = 128         # lane-dense padded feature dim (extra columns are zero)

HW = H * W       # 256
SS = S * S       # 1024
CHW = C * HW     # 768
NIMG = 2 * B     # image_0 and image_1 stacked on the batch axis
EPS = 1e-8

CLIP_MEAN = np.array([0.48145466, 0.4578275, 0.40821073], dtype=np.float32)
CLIP_STD = np.array([0.26862954, 0.26130258, 0.27577711], dtype=np.float32)

# mean/std normalization folded to scale/bias constants (no in-kernel divide).
SCALE = tuple(float(1.0 / s) for s in CLIP_STD)
BIAS = tuple(float(-m / s) for m, s in zip(CLIP_MEAN, CLIP_STD))


# --------------------- bicubic resize weight matrices (glue) ----------------
def _cubic(t, a=-0.75):
    at = np.abs(t)
    return np.where(
        at <= 1.0,
        (a + 2.0) * at**3 - (a + 3.0) * at**2 + 1.0,
        np.where(at < 2.0, a * at**3 - 5.0 * a * at**2 + 8.0 * a * at - 4.0 * a, 0.0),
    )


def bicubic_matrix(in_size, out_size):
    """Matrix M (out_size, in_size): resized = M @ signal.

    Matches torch.nn.functional.interpolate(mode='bicubic',
    align_corners=False) coordinate mapping and border clamping
    (no antialiasing — correct for the 16->32 upsample used here).
    """
    M = np.zeros((out_size, in_size), dtype=np.float32)
    scale = in_size / out_size
    for o in range(out_size):
        x = (o + 0.5) * scale - 0.5
        x0 = int(np.floor(x))
        for k in range(-1, 3):
            idx = x0 + k
            wgt = float(_cubic(x - idx))
            idx_c = min(max(idx, 0), in_size - 1)
            M[o, idx_c] += wgt
    return M


# ------------------------------ fused kernel ---------------------------------
def clip_similarity_kernel(x_ref, w_img_ref, b_img_ref, tok_ref, t_txt_ref,
                           out_ref):
    # ---------------- image path ----------------
    # Resize + CLIP normalization + projection folded into ONE bf16 matmul
    # against the precomputed (CHW, DP) weight, plus a bias row.
    x = x_ref[...].astype(jnp.bfloat16)                                  # (NIMG, CHW)
    f_img = jnp.dot(x, w_img_ref[...],
                    preferred_element_type=jnp.float32)                  # (NIMG, DP)
    f_img = f_img + b_img_ref[...]
    f_img = f_img * lax.rsqrt(
        jnp.maximum(jnp.sum(f_img * f_img, axis=-1, keepdims=True), EPS * EPS))

    # ---------------- text path ----------------
    # One-hot token counts (lane-parallel compares, no serial gather), then a
    # single matmul against the folded (embed @ w_txt) / SEQ table.
    tok = tok_ref[...]                                                   # (NIMG, SEQ) int32
    vocab_iota = lax.broadcasted_iota(jnp.int32, (NIMG, VOCAB), 1)
    counts = jnp.zeros((NIMG, VOCAB), jnp.float32)
    for l in range(SEQ):
        counts = counts + (tok[:, l:l + 1] == vocab_iota).astype(jnp.float32)
    f_txt = jnp.dot(counts.astype(jnp.bfloat16), t_txt_ref[...],
                    preferred_element_type=jnp.float32)                  # (NIMG, DP)
    f_txt = f_txt * lax.rsqrt(
        jnp.maximum(jnp.sum(f_txt * f_txt, axis=-1, keepdims=True), EPS * EPS))

    # ---------------- cosine similarities ----------------
    i0, i1 = f_img[0:B, :], f_img[B:2 * B, :]
    t0, t1 = f_txt[0:B, :], f_txt[B:2 * B, :]
    # Features are unit-norm -> sim_0 / sim_1 / sim_image are plain dots.
    sim0 = jnp.sum(i0 * t0, axis=-1, keepdims=True)
    sim1 = jnp.sum(i1 * t1, axis=-1, keepdims=True)
    simi = jnp.sum(i0 * i1, axis=-1, keepdims=True)
    di, dt = i1 - i0, t1 - t0
    ndi2 = jnp.maximum(jnp.sum(di * di, axis=-1, keepdims=True), EPS * EPS)
    ndt2 = jnp.maximum(jnp.sum(dt * dt, axis=-1, keepdims=True), EPS * EPS)
    simd = jnp.sum(di * dt, axis=-1, keepdims=True) * lax.rsqrt(ndi2 * ndt2)

    sims = jnp.concatenate([sim0, sim1, simd, simi], axis=-1)            # (B, 4)
    pad = jnp.zeros((B, DP - 4), jnp.float32)
    out_ref[...] = jnp.concatenate([sims, pad], axis=-1)                 # (B, DP) lane-dense


# ------------------------------ wrapper --------------------------------------
def clip_similarity_forward(image_0, image_1, tokens_0, tokens_1, params):
    """Mirrors ClipSimilarity.forward: returns (sim_0, sim_1, sim_direction, sim_image)."""
    imgs = jnp.concatenate([image_0, image_1], axis=0).astype(jnp.float32)  # (NIMG,C,H,W)
    x_flat = imgs.reshape(NIMG, CHW)                   # free contiguous reshape
    toks = jnp.concatenate([tokens_0, tokens_1], axis=0).astype(jnp.int32)  # (NIMG,SEQ)

    cost = pl.CostEstimate(
        flops=2 * NIMG * CHW * DP + 2 * NIMG * VOCAB * DP,
        transcendentals=4 * NIMG,
        bytes_accessed=(NIMG * CHW * 4 + CHW * DP * 2 + DP * 4
                        + NIMG * SEQ * 4 + VOCAB * DP * 2 + B * DP * 4))

    sims = pl.pallas_call(
        clip_similarity_kernel,
        out_shape=jax.ShapeDtypeStruct((B, DP), jnp.float32),
        grid=(1,),
        in_specs=[
            pl.BlockSpec((NIMG, CHW), lambda i: (0, 0)),     # flattened images (f32)
            pl.BlockSpec((CHW, DP), lambda i: (0, 0)),       # folded image weight (bf16)
            pl.BlockSpec((1, DP), lambda i: (0, 0)),         # folded image bias row (f32)
            pl.BlockSpec((NIMG, SEQ), lambda i: (0, 0)),     # tokens (int32, VMEM)
            pl.BlockSpec((VOCAB, DP), lambda i: (0, 0)),     # folded text table (bf16)
        ],
        out_specs=pl.BlockSpec((B, DP), lambda i: (0, 0)),
        compiler_params=pltpu.CompilerParams(
            dimension_semantics=("arbitrary",)),
        cost_estimate=cost,
    )(x_flat, params["w_img"], params["b_img"], toks, params["t_txt"])

    return sims[:, 0], sims[:, 1], sims[:, 2], sims[:, 3]


# ------------------------------ main ------------------------------------------
if __name__ == "__main__":
    key = jax.random.PRNGKey(0)
    k_img0, k_img1, k_t0, k_t1, k_wimg, k_emb, k_wtxt = jax.random.split(key, 7)

    # Bicubic resize matrices combined into one Kronecker-factored matrix:
    #   vec_rowmajor(WH @ X @ WWT) = vec_rowmajor(X) @ kron(WH^T, WWT)
    wh = bicubic_matrix(H, S)                     # (S, H)
    wwt = bicubic_matrix(W, S).T                  # (W, S)
    rt = np.kron(wh.T, wwt).astype(np.float32)    # (HW, SS)

    # Synthetic encoder weights (stand-ins for CLIP ViT / text transformer).
    w_img = np.asarray(jax.random.normal(k_wimg, (C * SS, D), jnp.float32)) * 0.02
    embed = np.asarray(jax.random.normal(k_emb, (VOCAB, EMB), jnp.float32)) * 0.02
    w_txt = np.asarray(jax.random.normal(k_wtxt, (EMB, D), jnp.float32)) * 0.02

    # ---- Fold resize + mean/std normalization + image projection (exact) ----
    #   f_img[n] = sum_c (vec(x_nc) @ rt * SCALE[c] + BIAS[c]) @ w_img_c
    #            = x_flat[n] @ W_fold + b
    w_blocks = [SCALE[c] * (rt @ w_img[c * SS:(c + 1) * SS, :]) for c in range(C)]
    w_img_fold = np.concatenate(w_blocks, axis=0).astype(np.float32)     # (CHW, D)
    b_img = np.zeros((D,), np.float32)
    for c in range(C):
        b_img += np.float32(BIAS[c]) * w_img[c * SS:(c + 1) * SS, :].sum(axis=0)

    # ---- Fold embedding + mean pool + text projection into one table ----
    t_txt = (embed @ w_txt).astype(np.float32) * np.float32(1.0 / SEQ)   # (VOCAB, D)

    def pad_cols(a, dp):
        return np.concatenate(
            [a, np.zeros((a.shape[0], dp - a.shape[1]), a.dtype)], axis=1)

    params = {
        # bf16 MXU operands (halves weight HBM/VMEM traffic); padding columns
        # are zero so norms / cosines are unaffected.
        "w_img": jnp.asarray(pad_cols(w_img_fold, DP), jnp.bfloat16),
        "b_img": jnp.asarray(pad_cols(b_img[None, :], DP), jnp.float32),
        "t_txt": jnp.asarray(pad_cols(t_txt, DP), jnp.bfloat16),
    }

    image_0 = jax.random.uniform(k_img0, (B, C, H, W), jnp.float32)
    image_1 = jax.random.uniform(k_img1, (B, C, H, W), jnp.float32)
    tokens_0 = jax.random.randint(k_t0, (B, SEQ), 0, VOCAB, jnp.int32)
    tokens_1 = jax.random.randint(k_t1, (B, SEQ), 0, VOCAB, jnp.int32)

    forward = jax.jit(clip_similarity_forward)
    sim_0, sim_1, sim_direction, sim_image = forward(
        image_0, image_1, tokens_0, tokens_1, params)
    jax.block_until_ready((sim_0, sim_1, sim_direction, sim_image))

    assert sim_0.shape == (B,) and sim_1.shape == (B,)
    assert sim_direction.shape == (B,) and sim_image.shape == (B,)
    assert bool(jnp.all(jnp.isfinite(
        jnp.stack([sim_0, sim_1, sim_direction, sim_image]))))
    print("KERNEL_OK")
</pallas_src>

<mosaic_0001>
module attributes {stable_mosaic.version = 11 : i64} {
  func.func @clip_similarity_kernel(%arg0: i32, %arg1: memref<4x768xf32, #tpu.memory_space<vmem>>, %arg2: memref<768x128xbf16, #tpu.memory_space<vmem>>, %arg3: memref<1x128xf32, #tpu.memory_space<vmem>>, %arg4: memref<4x8xi32, #tpu.memory_space<vmem>>, %arg5: memref<64x128xbf16, #tpu.memory_space<vmem>>, %arg6: memref<2x128xf32, #tpu.memory_space<vmem>>) attributes {dimension_semantics = [#tpu.dimension_semantics<arbitrary>], iteration_bounds = array<i64: 1>, scalar_prefetch = 0 : i64, scratch_operands = 0 : i64, tpu.core_type = #tpu.core_type<tc>, window_params = [{pipeline_mode = #tpu.pipeline_mode<synchronous>, transform_indices = @transform_0, window_bounds = array<i64: 4, 768>}, {pipeline_mode = #tpu.pipeline_mode<synchronous>, transform_indices = @transform_1, window_bounds = array<i64: 768, 128>}, {pipeline_mode = #tpu.pipeline_mode<synchronous>, transform_indices = @transform_2, window_bounds = array<i64: 1, 128>}, {pipeline_mode = #tpu.pipeline_mode<synchronous>, transform_indices = @transform_3, window_bounds = array<i64: 4, 8>}, {pipeline_mode = #tpu.pipeline_mode<synchronous>, transform_indices = @transform_4, window_bounds = array<i64: 64, 128>}, {pipeline_mode = #tpu.pipeline_mode<synchronous>, transform_indices = @transform_5, window_bounds = array<i64: 2, 128>}]} {
    %c0 = arith.constant 0 : index
    %c0_0 = arith.constant 0 : index
    %0 = vector.load %arg1[%c0, %c0_0] : memref<4x768xf32, #tpu.memory_space<vmem>>, vector<4x768xf32>
    %1 = arith.truncf %0 : vector<4x768xf32> to vector<4x768xbf16>
    %c0_1 = arith.constant 0 : index
    %c0_2 = arith.constant 0 : index
    %2 = vector.load %arg2[%c0_1, %c0_2] : memref<768x128xbf16, #tpu.memory_space<vmem>>, vector<768x128xbf16>
    %cst = arith.constant dense<0.000000e+00> : vector<4x128xf32>
    %3 = tpu.matmul %1, %2, %cst {dimension_numbers = #tpu.dot_dimension_numbers<[1], [0], [0], [1], [0, 0, 1, 1], [], []>} : vector<4x768xbf16>, vector<768x128xbf16>, vector<4x128xf32> -> vector<4x128xf32>
    %c0_3 = arith.constant 0 : index
    %c0_4 = arith.constant 0 : index
    %4 = vector.load %arg3[%c0_3, %c0_4] : memref<1x128xf32, #tpu.memory_space<vmem>>, vector<1x128xf32>
    %5 = vector.broadcast %4 : vector<1x128xf32> to vector<4x128xf32>
    %6 = arith.addf %3, %5 : vector<4x128xf32>
    %7 = arith.mulf %6, %6 : vector<4x128xf32>
    %cst_5 = arith.constant dense<0.000000e+00> : vector<4xf32>
    %8 = vector.multi_reduction <add>, %7, %cst_5 [1] : vector<4x128xf32> to vector<4xf32>
    %9 = vector.shape_cast %8 : vector<4xf32> to vector<4x1xf32>
    %cst_6 = arith.constant 1.000000e-16 : f32
    %10 = vector.broadcast %cst_6 : f32 to vector<4x1xf32>
    %11 = arith.maximumf %9, %10 : vector<4x1xf32>
    %12 = math.rsqrt %11 : vector<4x1xf32>
    %13 = vector.broadcast %12 : vector<4x1xf32> to vector<4x128xf32>
    %14 = arith.mulf %6, %13 : vector<4x128xf32>
    %c0_7 = arith.constant 0 : index
    %c0_8 = arith.constant 0 : index
    %15 = vector.load %arg4[%c0_7, %c0_8] : memref<4x8xi32, #tpu.memory_space<vmem>>, vector<4x8xi32>
    %16 = tpu.iota {dimensions = array<i32: 1>} : vector<4x64xi32>
    %cst_9 = arith.constant 0.000000e+00 : f32
    %17 = vector.broadcast %cst_9 : f32 to vector<4x64xf32>
    %18 = vector.extract_strided_slice %15 {offsets = [0, 0], sizes = [4, 1], strides = [1, 1]} : vector<4x8xi32> to vector<4x1xi32>
    %19 = vector.broadcast %18 : vector<4x1xi32> to vector<4x64xi32>
    %20 = arith.cmpi eq, %19, %16 : vector<4x64xi32>
    %21 = arith.extui %20 : vector<4x64xi1> to vector<4x64xi32>
    %22 = arith.sitofp %21 : vector<4x64xi32> to vector<4x64xf32>
    %23 = arith.addf %17, %22 : vector<4x64xf32>
    %24 = vector.extract_strided_slice %15 {offsets = [0, 1], sizes = [4, 1], strides = [1, 1]} : vector<4x8xi32> to vector<4x1xi32>
    %25 = vector.broadcast %24 : vector<4x1xi32> to vector<4x64xi32>
    %26 = arith.cmpi eq, %25, %16 : vector<4x64xi32>
    %27 = arith.extui %26 : vector<4x64xi1> to vector<4x64xi32>
    %28 = arith.sitofp %27 : vector<4x64xi32> to vector<4x64xf32>
    %29 = arith.addf %23, %28 : vector<4x64xf32>
    %30 = vector.extract_strided_slice %15 {offsets = [0, 2], sizes = [4, 1], strides = [1, 1]} : vector<4x8xi32> to vector<4x1xi32>
    %31 = vector.broadcast %30 : vector<4x1xi32> to vector<4x64xi32>
    %32 = arith.cmpi eq, %31, %16 : vector<4x64xi32>
    %33 = arith.extui %32 : vector<4x64xi1> to vector<4x64xi32>
    %34 = arith.sitofp %33 : vector<4x64xi32> to vector<4x64xf32>
    %35 = arith.addf %29, %34 : vector<4x64xf32>
    %36 = vector.extract_strided_slice %15 {offsets = [0, 3], sizes = [4, 1], strides = [1, 1]} : vector<4x8xi32> to vector<4x1xi32>
    %37 = vector.broadcast %36 : vector<4x1xi32> to vector<4x64xi32>
    %38 = arith.cmpi eq, %37, %16 : vector<4x64xi32>
    %39 = arith.extui %38 : vector<4x64xi1> to vector<4x64xi32>
    %40 = arith.sitofp %39 : vector<4x64xi32> to vector<4x64xf32>
    %41 = arith.addf %35, %40 : vector<4x64xf32>
    %42 = vector.extract_strided_slice %15 {offsets = [0, 4], sizes = [4, 1], strides = [1, 1]} : vector<4x8xi32> to vector<4x1xi32>
    %43 = vector.broadcast %42 : vector<4x1xi32> to vector<4x64xi32>
    %44 = arith.cmpi eq, %43, %16 : vector<4x64xi32>
    %45 = arith.extui %44 : vector<4x64xi1> to vector<4x64xi32>
    %46 = arith.sitofp %45 : vector<4x64xi32> to vector<4x64xf32>
    %47 = arith.addf %41, %46 : vector<4x64xf32>
    %48 = vector.extract_strided_slice %15 {offsets = [0, 5], sizes = [4, 1], strides = [1, 1]} : vector<4x8xi32> to vector<4x1xi32>
    %49 = vector.broadcast %48 : vector<4x1xi32> to vector<4x64xi32>
    %50 = arith.cmpi eq, %49, %16 : vector<4x64xi32>
    %51 = arith.extui %50 : vector<4x64xi1> to vector<4x64xi32>
    %52 = arith.sitofp %51 : vector<4x64xi32> to vector<4x64xf32>
    %53 = arith.addf %47, %52 : vector<4x64xf32>
    %54 = vector.extract_strided_slice %15 {offsets = [0, 6], sizes = [4, 1], strides = [1, 1]} : vector<4x8xi32> to vector<4x1xi32>
    %55 = vector.broadcast %54 : vector<4x1xi32> to vector<4x64xi32>
    %56 = arith.cmpi eq, %55, %16 : vector<4x64xi32>
    %57 = arith.extui %56 : vector<4x64xi1> to vector<4x64xi32>
    %58 = arith.sitofp %57 : vector<4x64xi32> to vector<4x64xf32>
    %59 = arith.addf %53, %58 : vector<4x64xf32>
    %60 = vector.extract_strided_slice %15 {offsets = [0, 7], sizes = [4, 1], strides = [1, 1]} : vector<4x8xi32> to vector<4x1xi32>
    %61 = vector.broadcast %60 : vector<4x1xi32> to vector<4x64xi32>
    %62 = arith.cmpi eq, %61, %16 : vector<4x64xi32>
    %63 = arith.extui %62 : vector<4x64xi1> to vector<4x64xi32>
    %64 = arith.sitofp %63 : vector<4x64xi32> to vector<4x64xf32>
    %65 = arith.addf %59, %64 : vector<4x64xf32>
    %66 = arith.truncf %65 : vector<4x64xf32> to vector<4x64xbf16>
    %c0_10 = arith.constant 0 : index
    %c0_11 = arith.constant 0 : index
    %67 = vector.load %arg5[%c0_10, %c0_11] : memref<64x128xbf16, #tpu.memory_space<vmem>>, vector<64x128xbf16>
    %cst_12 = arith.constant dense<0.000000e+00> : vector<4x128xf32>
    %68 = tpu.matmul %66, %67, %cst_12 {dimension_numbers = #tpu.dot_dimension_numbers<[1], [0], [0], [1], [0, 0, 1, 1], [], []>} : vector<4x64xbf16>, vector<64x128xbf16>, vector<4x128xf32> -> vector<4x128xf32>
    %69 = arith.mulf %68, %68 : vector<4x128xf32>
    %cst_13 = arith.constant dense<0.000000e+00> : vector<4xf32>
    %70 = vector.multi_reduction <add>, %69, %cst_13 [1] : vector<4x128xf32> to vector<4xf32>
    %71 = vector.shape_cast %70 : vector<4xf32> to vector<4x1xf32>
    %cst_14 = arith.constant 1.000000e-16 : f32
    %72 = vector.broadcast %cst_14 : f32 to vector<4x1xf32>
    %73 = arith.maximumf %71, %72 : vector<4x1xf32>
    %74 = math.rsqrt %73 : vector<4x1xf32>
    %75 = vector.broadcast %74 : vector<4x1xf32> to vector<4x128xf32>
    %76 = arith.mulf %68, %75 : vector<4x128xf32>
    %77 = vector.extract_strided_slice %14 {offsets = [0, 0], sizes = [2, 128], strides = [1, 1]} : vector<4x128xf32> to vector<2x128xf32>
    %78 = vector.extract_strided_slice %14 {offsets = [2, 0], sizes = [2, 128], strides = [1, 1]} : vector<4x128xf32> to vector<2x128xf32>
    %79 = vector.extract_strided_slice %76 {offsets = [0, 0], sizes = [2, 128], strides = [1, 1]} : vector<4x128xf32> to vector<2x128xf32>
    %80 = vector.extract_strided_slice %76 {offsets = [2, 0], sizes = [2, 128], strides = [1, 1]} : vector<4x128xf32> to vector<2x128xf32>
    %81 = arith.mulf %77, %79 : vector<2x128xf32>
    %cst_15 = arith.constant dense<0.000000e+00> : vector<2xf32>
    %82 = vector.multi_reduction <add>, %81, %cst_15 [1] : vector<2x128xf32> to vector<2xf32>
    %83 = vector.shape_cast %82 : vector<2xf32> to vector<2x1xf32>
    %84 = arith.mulf %78, %80 : vector<2x128xf32>
    %cst_16 = arith.constant dense<0.000000e+00> : vector<2xf32>
    %85 = vector.multi_reduction <add>, %84, %cst_16 [1] : vector<2x128xf32> to vector<2xf32>
    %86 = vector.shape_cast %85 : vector<2xf32> to vector<2x1xf32>
    %87 = arith.mulf %77, %78 : vector<2x128xf32>
    %cst_17 = arith.constant dense<0.000000e+00> : vector<2xf32>
    %88 = vector.multi_reduction <add>, %87, %cst_17 [1] : vector<2x128xf32> to vector<2xf32>
    %89 = vector.shape_cast %88 : vector<2xf32> to vector<2x1xf32>
    %90 = arith.subf %78, %77 : vector<2x128xf32>
    %91 = arith.subf %80, %79 : vector<2x128xf32>
    %92 = arith.mulf %90, %90 : vector<2x128xf32>
    %cst_18 = arith.constant dense<0.000000e+00> : vector<2xf32>
    %93 = vector.multi_reduction <add>, %92, %cst_18 [1] : vector<2x128xf32> to vector<2xf32>
    %94 = vector.shape_cast %93 : vector<2xf32> to vector<2x1xf32>
    %cst_19 = arith.constant 1.000000e-16 : f32
    %95 = vector.broadcast %cst_19 : f32 to vector<2x1xf32>
    %96 = arith.maximumf %94, %95 : vector<2x1xf32>
    %97 = arith.mulf %91, %91 : vector<2x128xf32>
    %cst_20 = arith.constant dense<0.000000e+00> : vector<2xf32>
    %98 = vector.multi_reduction <add>, %97, %cst_20 [1] : vector<2x128xf32> to vector<2xf32>
    %99 = vector.shape_cast %98 : vector<2xf32> to vector<2x1xf32>
    %cst_21 = arith.constant 1.000000e-16 : f32
    %100 = vector.broadcast %cst_21 : f32 to vector<2x1xf32>
    %101 = arith.maximumf %99, %100 : vector<2x1xf32>
    %102 = arith.mulf %90, %91 : vector<2x128xf32>
    %cst_22 = arith.constant dense<0.000000e+00> : vector<2xf32>
    %103 = vector.multi_reduction <add>, %102, %cst_22 [1] : vector<2x128xf32> to vector<2xf32>
    %104 = vector.shape_cast %103 : vector<2xf32> to vector<2x1xf32>
    %105 = arith.mulf %96, %101 : vector<2x1xf32>
    %106 = math.rsqrt %105 : vector<2x1xf32>
    %107 = arith.mulf %104, %106 : vector<2x1xf32>
    %108 = tpu.concatenate %83, %86, %107, %89 in 1 : vector<2x1xf32>, vector<2x1xf32>, vector<2x1xf32>, vector<2x1xf32> -> vector<2x4xf32>
    %cst_23 = arith.constant 0.000000e+00 : f32
    %109 = vector.broadcast %cst_23 : f32 to vector<2x124xf32>
    %110 = tpu.concatenate %108, %109 in 1 : vector<2x4xf32>, vector<2x124xf32> -> vector<2x128xf32>
    %c0_24 = arith.constant 0 : index
    %c0_25 = arith.constant 0 : index
    %111 = vector.load %arg6[%c0_24, %c0_25] : memref<2x128xf32, #tpu.memory_space<vmem>>, vector<2x128xf32>
    tpu.vector_store %arg6[%c0_24, %c0_25], %110 {strides = array<i32>} : memref<2x128xf32, #tpu.memory_space<vmem>>, vector<2x128xf32>,
    return
  }
  func.func @transform_0(%arg0: i32) -> (i32, i32) {
    %c0_i32 = arith.constant 0 : i32
    %c0_i32_0 = arith.constant 0 : i32
    %c0_i32_1 = arith.constant 0 : i32
    return %c0_i32, %c0_i32_0 : i32, i32
  }
  func.func @transform_1(%arg0: i32) -> (i32, i32) {
    %c0_i32 = arith.constant 0 : i32
    %c0_i32_0 = arith.constant 0 : i32
    %c0_i32_1 = arith.constant 0 : i32
    return %c0_i32, %c0_i32_0 : i32, i32
  }
  func.func @transform_2(%arg0: i32) -> (i32, i32) {
    %c0_i32 = arith.constant 0 : i32
    %c0_i32_0 = arith.constant 0 : i32
    %c0_i32_1 = arith.constant 0 : i32
    return %c0_i32, %c0_i32_0 : i32, i32
  }
  func.func @transform_3(%arg0: i32) -> (i32, i32) {
    %c0_i32 = arith.constant 0 : i32
    %c0_i32_0 = arith.constant 0 : i32
    %c0_i32_1 = arith.constant 0 : i32
    return %c0_i32, %c0_i32_0 : i32, i32
  }
  func.func @transform_4(%arg0: i32) -> (i32, i32) {
    %c0_i32 = arith.constant 0 : i32
    %c0_i32_0 = arith.constant 0 : i32
    %c0_i32_1 = arith.constant 0 : i32
    return %c0_i32, %c0_i32_0 : i32, i32
  }
  func.func @transform_5(%arg0: i32) -> (i32, i32) {
    %c0_i32 = arith.constant 0 : i32
    %c0_i32_0 = arith.constant 0 : i32
    %c0_i32_1 = arith.constant 0 : i32
    return %c0_i32, %c0_i32_0 : i32, i32
  }
}

</mosaic_0001>

<bundles_post_ra>
// kernel: clip_similarity_forward.1
= control target key start
LH: loop header
LB: loop body
LE: loop exit
PB: predicated region body
PF: predicated region fallthrough
CT: control target
= control target key end

     0   :  { %v985_v0 = vmov 2   ;;  %v986_v1 = vmov 0   ;;  %v987_v7 = vmov 3   ;;  %v988_v8 = vmov 1   ;;  %s1216_s3 = inlined_call_operand.vmem [shape: s32[4,8], index: 3, kind: input, shape index: {}]   ;;  %s1217_s1 = inlined_call_operand.vmem [shape: bf16[768,128], index: 1, kind: input, shape index: {}]   ;;  %s1218_s0 = inlined_call_operand.vmem [shape: f32[4,768], index: 0, kind: input, shape index: {}]   ;;  %s1219_s4 = inlined_call_operand.vmem [shape: bf16[64,128], index: 4, kind: input, shape index: {}]   ;;  %s1220_s2 = inlined_call_operand.vmem [shape: f32[1,128], index: 2, kind: input, shape index: {}]   ;;  %s1221_s5 = inlined_call_operand.vmem [shape: f32[2,128], index: 5, kind: output, shape index: {}]  }
   0x1   :  { %917 = vset.pattern.permute.xlu1 %v985_v0  ;;  %915 = vset.pattern.permute.xlu0 %v986_v1  ;;  %v558_v2 = vld [vmem:[%s1216_s3] sm:$0xf]  ;;  %v926_v5 = vld [vmem:[%s1217_s1 + $0x48] sm:$0xff]   ;;  %v928_v9 = vld [vmem:[%s1217_s1 + $0x50] sm:$0xff]   ;;  %v989_v12 = vmov 4   ;;  %v990_v13 = vmov 5  }
   0x2   :  { %576 = vperm.xlu1 %917, %v558_v2   ;;  %562 = vperm.xlu0 %915, %v558_v2   ;;  %v924_v3 = vld [vmem:[%s1217_s1 + $0x40] sm:$0xff]   ;;  %v927_v6 = vld [vmem:[%s1217_s1 + $0x8] sm:$0xff]   ;;  %v929_v10 = vld [vmem:[%s1217_s1 + $0x10] sm:$0xff]   ;;  %v991_v16 = vmov 6   ;;  %v992_v18 = vmov 7   ;;  %v993_v63 = vmov 0.0  }
   0x3   :  { %v925_v4 = vld [vmem:[%s1217_s1] sm:$0xff]   ;;  %822 = vmatprep.subr.bf16.mxu0 %v924_v3  ;;  %v930_v11 = vld [vmem:[%s1217_s1 + $0x58] sm:$0xff]   ;;  %v934_v19 = vld [vmem:[%s1217_s1 + $0x68] sm:$0xff]   ;;  %vm994_vm0 = vmmov 0   ;;  %vm650_vm9 = vcmask 523264   ;;  %vm551_vm10 = vcmask 1043456  }
   0x4   :  { %823 = vmatpush3.bf16.msra.mxu0 %v925_v4  ;;  %v931_v14 = vld [vmem:[%s1217_s1 + $0x18] sm:$0xff]   ;;  %v932_v15 = vld [vmem:[%s1217_s1 + $0x60] sm:$0xff]   ;;  %v935_v23 = vld [vmem:[%s1217_s1 + $0x28] sm:$0xff]   ;;  %vm706_vm11 = vcmask 1043458   ;;  %vm702_vm12 = vcmask 1041408   ;;  %vm747_vm13 = vcmask 7168  }
   0x5   :  { %824 = vmatprep.subr.bf16.mxu0 %v926_v5  ;;  %v933_v17 = vld [vmem:[%s1217_s1 + $0x20] sm:$0xff]   ;;  %v936_v25 = vld [vmem:[%s1217_s1 + $0x70] sm:$0xff]   ;;  %v945_v27 = vld [vmem:[%s1217_s1 + $0xc8] sm:$0xff]   ;;  %vm749_vm14 = vcmask 15360   ;;  %vm751_vm15 = vcmask 23552  }
   0x6   :  { %918 = vset.pattern.permute.xlu1 %v987_v7  ;;  %916 = vset.pattern.permute.xlu0 %v988_v8  ;;  %v940_v20 = vld [vmem:[%s1217_s1 + $0xc0] sm:$0xff]   ;;  %v946_v28 = vld [vmem:[%s1217_s1 + $0x88] sm:$0xff]   ;;  %v937_v29 = vld [vmem:[%s1217_s1 + $0x30] sm:$0xff]  }
   0x7   :  { %583 = vperm.xlu1 %918, %v558_v2   ;;  %569 = vperm.xlu0 %916, %v558_v2   ;;  %v941_v21 = vld [vmem:[%s1217_s1 + $0x80] sm:$0xff]   ;;  %v938_v30 = vld [vmem:[%s1217_s1 + $0x78] sm:$0xff]   ;;  %v949_v31 = vld [vmem:[%s1217_s1 + $0xd0] sm:$0xff]  }
   0x8   :  { %825 = vmatpush3.bf16.msra.mxu0 %v927_v6  ;;  %v21_v22 = vld [vmem:[%s1218_s0] sm:$0xff]  ;;  %844 = vmatprep.subr.bf16.mxu1 %v940_v20  ;;  %v950_v32 = vld [vmem:[%s1217_s1 + $0x90] sm:$0xff]   ;;  %v939_v33 = vld [vmem:[%s1217_s1 + $0x38] sm:$0xff]  }
   0x9   :  { %826 = vmatprep.subr.bf16.mxu0 %v928_v9  ;;  %v27_v24 = vcombine.high %v21_v22, %v21_v22  ;;  %845 = vmatpush3.bf16.msra.mxu1 %v941_v21  ;;  %v943_v34 = vld [vmem:[%s1217_s1 + $0x140] sm:$0xff]   ;;  %v953_v35 = vld [vmem:[%s1217_s1 + $0xd8] sm:$0xff]   ;;  %v33_v37 = vpack.c.bf16 %v21_v22, %v21_v22  ;;  %v947_v39 = vld [vmem:[%s1217_s1 + $0x148] sm:$0xff]  }
   0xa   :  { %846 = vmatprep.subr.bf16.mxu1 %v945_v27  ;;  %v954_v36 = vld [vmem:[%s1217_s1 + $0x98] sm:$0xff]   ;;  %v944_v38 = vld [vmem:[%s1217_s1 + $0x100] sm:$0xff]   ;;  %v948_v42 = vld [vmem:[%s1217_s1 + $0x108] sm:$0xff]  }
   0xb   :  { %919 = vset.pattern.permute.xlu1 %v989_v12  ;;  %920 = vset.pattern.permute.xlu0 %v990_v13  ;;  %v34_v26 = vpack.c.bf16 %v27_v24, %v27_v24  ;;  %v957_v40 = vld [vmem:[%s1217_s1 + $0xe0] sm:$0xff]   ;;  %v951_v43 = vld [vmem:[%s1217_s1 + $0x150] sm:$0xff]   ;;  %v961_v44 = vld [vmem:[%s1217_s1 + $0xe8] sm:$0xff]  }
   0xc   :  { %590 = vperm.xlu1 %919, %v558_v2   ;;  %597 = vperm.xlu0 %920, %v558_v2   ;;  %v958_v41 = vld [vmem:[%s1217_s1 + $0xa0] sm:$0xff]   ;;  %v962_v45 = vld [vmem:[%s1217_s1 + $0xa8] sm:$0xff]   ;;  %v952_v46 = vld [vmem:[%s1217_s1 + $0x110] sm:$0xff]  }
   0xd   :  { %827 = vmatpush3.bf16.msra.mxu0 %v929_v10  ;;  %462 = vmatprep.mubr.bf16.mxu0 %v34_v26  ;;  %v955_v47 = vld [vmem:[%s1217_s1 + $0x158] sm:$0xff]   ;;  %v965_v48 = vld [vmem:[%s1217_s1 + $0xf0] sm:$0xff]   ;;  %v959_v51 = vld [vmem:[%s1217_s1 + $0x160] sm:$0xff]   ;;  %v559_v10 = vlaneseq }
   0xe   :  { %828 = vmatprep.subr.bf16.mxu0 %v930_v11  ;;  %847 = vmatpush3.bf16.msra.mxu1 %v946_v28  ;;  %v966_v49 = vld [vmem:[%s1217_s1 + $0xb0] sm:$0xff]   ;;  %v956_v50 = vld [vmem:[%s1217_s1 + $0x118] sm:$0xff]   ;;  %v960_v54 = vld [vmem:[%s1217_s1 + $0x120] sm:$0xff]  }
   0xf   :  { %848 = vmatprep.subr.bf16.mxu1 %v949_v31  ;;  %v969_v52 = vld [vmem:[%s1217_s1 + $0xf8] sm:$0xff]   ;;  %v22_v55 = vld [vmem:[%s1218_s0 + $0x8] sm:$0xff]  ;;  %v23_v59 = vld [vmem:[%s1218_s0 + $0x10] sm:$0xff]  ;;  %v560_v13 = vand.u32 127, %v559_v10 }
  0x10   :  { %921 = vset.pattern.permute.xlu1 %v991_v16  ;;  %923 = vset.pattern.permute.xlu0 %v992_v18  ;;  %v970_v53 = vld [vmem:[%s1217_s1 + $0xb8] sm:$0xff]   ;;  %v963_v56 = vld [vmem:[%s1217_s1 + $0x168] sm:$0xff]   ;;  %v28_v57 = vcombine.high %v22_v55, %v22_v55  ;;  %v35_v58 = vpack.c.bf16 %v22_v55, %v22_v55  ;;  %v29_v61 = vcombine.high %v23_v59, %v23_v59  ;;  %v975_v62 = vld [vmem:[%s1219_s4] sm:$0xff]  }
  0x11   :  { %604 = vperm.xlu1 %921, %v558_v2   ;;  %829 = vmatpush3.bf16.msra.mxu0 %v931_v14  ;;  %v964_v0 = vld [vmem:[%s1217_s1 + $0x128] sm:$0xff]   ;;  %v968_v4 = vld [vmem:[%s1217_s1 + $0x130] sm:$0xff]   ;;  %v971_v5 = vld [vmem:[%s1217_s1 + $0x178] sm:$0xff]   ;;  %v37_v9 = vpack.c.bf16 %v23_v59, %v23_v59 }
  0x12   :  { %830 = vmatprep.subr.bf16.mxu0 %v932_v15  ;;  %849 = vmatpush3.bf16.msra.mxu1 %v950_v32  ;;  %v36_v60 = vpack.c.bf16 %v28_v57, %v28_v57  ;;  %v38_v1 = vpack.c.bf16 %v29_v61, %v29_v61  ;;  %v976_v3 = vld [vmem:[%s1219_s4 + $0x8] sm:$0xff]   ;;  %v977_v6 = vld [vmem:[%s1219_s4 + $0x10] sm:$0xff]   ;;  %v973_v7 = vld [vmem:[%s1217_s1 + $0x138] sm:$0xff]  }
  0x13   :  { %850 = vmatprep.subr.bf16.mxu1 %v953_v35  ;;  %v978_v8 = vld [vmem:[%s1219_s4 + $0x18] sm:$0xff]  }
  0x14   :  { %502 = vmatprep.mubr.bf16.mxu1 %v36_v60 }
  0x15   :  { %922 = vset.pattern.permute.xlu1 %v992_v18  ;;  %831 = vmatpush3.bf16.msra.mxu0 %v933_v17 }
  0x16   :  { %611 = vperm.xlu1 %922, %v558_v2   ;;  %832 = vmatprep.subr.bf16.mxu0 %v934_v19  ;;  %v967_v2 = vld [vmem:[%s1217_s1 + $0x170] sm:$0xff]  }
  0x17   :  { %851 = vmatpush3.bf16.msra.mxu1 %v954_v36 }
  0x18   :  { %852 = vmatprep.subr.bf16.mxu1 %v957_v40 }
  0x19   :  { %833 = vmatpush3.bf16.msra.mxu0 %v935_v23 }
  0x1a   :  { %834 = vmatprep.subr.bf16.mxu0 %v936_v25 }
  0x1b   :  { %853 = vmatpush3.bf16.msra.mxu1 %v958_v41  ;;  %v760_v41 = vld [vmem:[%s1220_s2] ss:$0 sm:$0xff] }
  0x1c   :  { %854 = vmatprep.subr.bf16.mxu1 %v961_v44 }
  0x1d   :  { %835 = vmatpush3.bf16.msra.mxu0 %v937_v29 }
  0x1e   :  { %836 = vmatprep.subr.bf16.mxu0 %v938_v30 }
  0x1f   :  { %855 = vmatpush3.bf16.msra.mxu1 %v962_v45 }
  0x20   :  { %856 = vmatprep.subr.bf16.mxu1 %v965_v48 }
  0x21   :  { %837 = vmatpush3.bf16.msra.mxu0 %v939_v33 }
  0x22   :  { %866 = vmatprep.subr.bf16.mxu0 %v943_v34 }
  0x23   :  { %857 = vmatpush3.bf16.msra.mxu1 %v966_v49 }
  0x24   :  { %463 = vmatmul.mubr.bf16.vlgmr.msra.gmra.mrb[0].mxu0 %v33_v37  ;;  %858 = vmatprep.subr.bf16.mxu1 %v969_v52 }
  0x25   :  { %867 = vmatpush3.bf16.msra.mxu0 %v944_v38  ;;  %542 = vmatprep.mubr.bf16.mxu0 %v38_v1 }
  0x26   :  { %868 = vmatprep.subr.bf16.mxu0 %v947_v39 }
  0x27   :  { %859 = vmatpush3.bf16.msra.mxu1 %v970_v53 }
  0x28   :  { %893 = vmatprep.subr.bf16.mxu1 %v993_v63 }
  0x29   :  { %869 = vmatpush3.bf16.msra.mxu0 %v948_v42 }
  0x2a   :  { %870 = vmatprep.subr.bf16.mxu0 %v951_v43  ;;  %503 = vmatmul.mubr.bf16.vlgmr.msra.gmra.mrb[0].mxu1 %v35_v58 }
  0x2b   :  { %894 = vmatpush3.bf16.msra.mxu1 %v975_v62  ;;  %901 = vmatprep.mubr.msk.bf16.mxu1 %vm994_vm0, %v993_v63  ;;  %vm753_vm0 = vcmask 31744  }
  0x2c   :  { %895 = vmatprep.subr.bf16.mxu1 %v993_v63 }
  0x2d   :  { %871 = vmatpush3.bf16.msra.mxu0 %v952_v46 }
  0x2e   :  { %872 = vmatprep.subr.bf16.mxu0 %v955_v47 }
  0x2f   :  { %896 = vmatpush3.bf16.msra.mxu1 %v976_v3 }
  0x30   :  { %897 = vmatprep.subr.bf16.mxu1 %v993_v63 }
  0x31   :  { %873 = vmatpush3.bf16.msra.mxu0 %v956_v50 }
  0x32   :  { %874 = vmatprep.subr.bf16.mxu0 %v959_v51 }
  0x33   :  { %898 = vmatpush3.bf16.msra.mxu1 %v977_v6 }
  0x34   :  { %899 = vmatprep.subr.bf16.mxu1 %v993_v63 }
  0x35   :  { %875 = vmatpush3.bf16.msra.mxu0 %v960_v54 }
  0x36   :  { %876 = vmatprep.subr.bf16.mxu0 %v963_v56 }
  0x37   :  { %900 = vmatpush3.bf16.msra.mxu1 %v978_v8 }
  0x39   :  { %877 = vmatpush3.bf16.msra.mxu0 %v964_v0 }
  0x3a   :  { %878 = vmatprep.subr.bf16.mxu0 %v967_v2 }
  0x3d   :  { %879 = vmatpush3.bf16.msra.mxu0 %v968_v4 }
  0x3e   :  { %880 = vmatprep.subr.bf16.mxu0 %v971_v5 }
  0x41   :  { %881 = vmatpush3.bf16.msra.mxu0 %v973_v7 }
  0x44   :  { %543 = vmatmul.mubr.bf16.vlgmr.msra.gmra.mrb[4].mxu0 %v37_v9 }
  0x81   :  { %v577_v11 = vpop.permute.xlu1 %576  ;;  %v563_v12 = vpop.permute.xlu0 %562 }
  0x82   :  { %vm564_vm1 = vcmp.eq.s32.totalorder %v563_v12, %v560_v13  ;;  %vm578_vm2 = vcmp.eq.s32.totalorder %v577_v11, %v560_v13 }
  0x83   :  { %v809_v16 = vsel %vm564_vm1, 1.0, %v993_v63  ;;  %v811_v19 = vsel %vm578_vm2, 1.0, %v993_v63 }
  0x86   :  { %v584_v14 = vpop.permute.xlu1 %583  ;;  %v570_v15 = vpop.permute.xlu0 %569 }
  0x87   :  { %vm571_vm3 = vcmp.eq.s32.totalorder %v570_v15, %v560_v13  ;;  %vm585_vm4 = vcmp.eq.s32.totalorder %v584_v14, %v560_v13 }
  0x88   :  { %v810_v17 = vsel %vm571_vm3, 1.0, %v993_v63  ;;  %v812_v23 = vsel %vm585_vm4, 1.0, %v993_v63 }
  0x89   :  { %v574_v18 = vadd.f32 %v810_v17, %v809_v16 }
  0x8b   :  { %v581_v20 = vadd.f32 %v811_v19, %v574_v18  ;;  %v591_v21 = vpop.permute.xlu1 %590  ;;  %v598_v22 = vpop.permute.xlu0 %597 }
  0x8c   :  { %vm592_vm5 = vcmp.eq.s32.totalorder %v591_v21, %v560_v13  ;;  %vm599_vm6 = vcmp.eq.s32.totalorder %v598_v22, %v560_v13 }
  0x8d   :  { %v588_v24 = vadd.f32 %v812_v23, %v581_v20  ;;  %v813_v25 = vsel %vm592_vm5, 1.0, %v993_v63  ;;  %v814_v27 = vsel %vm599_vm6, 1.0, %v993_v63 }
  0x8f   :  { %v595_v26 = vadd.f32 %v813_v25, %v588_v24 }
  0x90   :  { %v605_v28 = vpop.permute.xlu1 %604 }
  0x91   :  { %vm606_vm7 = vcmp.eq.s32.totalorder %v605_v28, %v560_v13  ;;  %v602_v29 = vadd.f32 %v814_v27, %v595_v26 }
  0x92   :  { %v815_v30 = vsel %vm606_vm7, 1.0, %v993_v63 }
  0x93   :  { %v609_v32 = vadd.f32 %v815_v30, %v602_v29 }
  0x95   :  { %v612_v31 = vpop.permute.xlu1 %611 }
  0x96   :  { %vm613_vm8 = vcmp.eq.s32.totalorder %v612_v31, %v560_v13 }
  0x97   :  { %v816_v33 = vsel %vm613_vm8, 1.0, %v993_v63 }
  0x98   :  { %v616_v34 = vadd.f32 %v816_v33, %v609_v32 }
  0x9a   :  { %v617_v35 = vpack.c.bf16 %v616_v34, %v616_v34 }
  0x9c   :  { %902 = vmatmul.mubr.msk.bf16.vlgmr.msra.gmra.mrb[4].mxu1 %vm650_vm9, %v617_v35 }
  0xf7   :  { %v838_v36 = vpop.f32.mrb[0].mxu0 }
  0xf8   :  { %v839_v37 = vpop.f32.mrb[1].mxu0 }
  0xf9   :  { %v840_v38 = vadd.f32 %v839_v37, %v838_v36  ;;  %v841_v39 = vpop.f32.mrb[2].mxu0 }
  0xfa   :  { %v842_v40 = vpop.f32.mrb[3].mxu0 }
  0xfb   :  { %v465_v42 = vadd.f32 %v840_v38, %v760_v41 }
  0xfd   :  { %v860_v43 = vpop.f32.mrb[0].mxu1 }
  0xfe   :  { %v861_v44 = vpop.f32.mrb[1].mxu1 }
  0xff   :  { %v862_v45 = vadd.f32 %v861_v44, %v860_v43  ;;  %v863_v46 = vpop.f32.mrb[2].mxu1 }
 0x100   :  { %v864_v47 = vpop.f32.mrb[3].mxu1 }
 0x101   :  { %v505_v48 = vadd.f32 %v862_v45, %v465_v42 }
 0x117   :  { %v882_v49 = vpop.f32.mrb[4].mxu0 }
 0x118   :  { %v883_v50 = vpop.f32.mrb[5].mxu0 }
 0x119   :  { %v884_v51 = vadd.f32 %v883_v50, %v882_v49  ;;  %v885_v52 = vpop.f32.mrb[6].mxu0 }
 0x11a   :  { %v886_v53 = vpop.f32.mrb[7].mxu0 }
 0x11b   :  { %v545_v54 = vadd.f32 %v884_v51, %v505_v48 }
 0x11d   :  { %v550_v55 = vmul.f32 %v545_v54, %v545_v54 }
 0x11f   :  { %v552_v56 = vsel %vm551_vm10, %v550_v55, 0.0 }
 0x120   :  { %553 = vadd.xlane.f32.xlu0 %v552_v56 }
 0x16f   :  { %v688_v57 = vpop.f32.mrb[4].mxu1 }
 0x170   :  { %v694_v58 = vmul.f32 %v688_v57, %v688_v57  ;;  %v903_v59 = vpop.f32.mrb[5].mxu1 }
 0x171   :  { %v691_v60 = vpop.f32.mrb[6].mxu1 }
 0x172   :  { %v904_v61 = vpop.f32.mrb[7].mxu1  ;;  %v695_v62 = vsel %vm551_vm10, %v694_v58, 0.0 }
 0x173   :  { %696 = vadd.xlane.f32.xlu1 %v695_v62 }
 0x1ad   :  { %v554_v63 = vpop.xlane.xlu0 %553 }
 0x1ae   :  { %v555_v0 = vmax.f32 %v554_v63, 1e-16 }
 0x1b0   :  { %979 = vrsqrt.f32 %v555_v0 }
 0x1ba   :  { %v980_v1 = vpop.eup %979 }
 0x1bb   :  { %v557_v2 = vmul.f32 %v980_v1, %v545_v54 }
 0x1bd   :  { %v717_v3 = vrot.slane %v557_v2, 6  ;;  %v711_v18 = vrot.slane %v557_v2, 2 }
 0x1bf   :  { %v719_v4 = vsub.f32 %v557_v2, %v717_v3  ;;  %v713_v21 = vmul.f32 %v711_v18, %v557_v2 }
 0x1c1   :  { %v724_v5 = vmul.f32 %v719_v4, %v719_v4  ;;  %v714_v22 = vsel %vm702_vm12, %v713_v21, 0.0 }
 0x1c3   :  { %v725_v6 = vsel %vm706_vm11, %v724_v5, 0.0 }
 0x1c4   :  { %726 = vadd.xlane.f32.xlu0 %v725_v6 }
 0x200   :  { %v697_v7 = vpop.xlane.xlu1 %696 }
 0x201   :  { %v698_v8 = vmax.f32 %v697_v7, 1e-16 }
 0x203   :  { %981 = vrsqrt.f32 %v698_v8 }
 0x20d   :  { %v982_v9 = vpop.eup %981 }
 0x20e   :  { %v700_v10 = vmul.f32 %v982_v9, %v688_v57 }
 0x210   :  { %v721_v11 = vrot.slane %v700_v10, 6  ;;  %v701_v17 = vmul.f32 %v700_v10, %v557_v2 }
 0x212   :  { %v723_v12 = vsub.f32 %v700_v10, %v721_v11  ;;  %v707_v19 = vsel %vm706_vm11, %v701_v17, 0.0  ;;  %v703_v20 = vsel %vm702_vm12, %v701_v17, 0.0 }
 0x214   :  { %v734_v13 = vmul.f32 %v723_v12, %v719_v4  ;;  %v729_v14 = vmul.f32 %v723_v12, %v723_v12 }
 0x216   :  { %v735_v15 = vsel %vm706_vm11, %v734_v13, 0.0  ;;  %v730_v16 = vsel %vm706_vm11, %v729_v14, 0.0 }
 0x217   :  { %736 = vadd.xlane.f32.xlu1 %v735_v15  ;;  %731 = vadd.xlane.f32.xlu0 %v730_v16 }
 0x21b   :  { %708 = vadd.xlane.f32.xlu0 %v707_v19  ;;  %704 = vadd.xlane.f32.xlu1 %v703_v20 }
 0x21f   :  { %715 = vadd.xlane.f32.xlu0 %v714_v22 }
 0x251   :  { %v727_v23 = vpop.xlane.xlu0 %726 }
 0x252   :  { %v728_v25 = vmax.f32 %v727_v23, 1e-16 }
 0x2a4   :  { %v732_v24 = vpop.xlane.xlu0 %731  ;;  %v737_v28 = vpop.xlane.xlu1 %736 }
 0x2a5   :  { %v733_v26 = vmax.f32 %v732_v24, 1e-16 }
 0x2a7   :  { %v738_v27 = vmul.f32 %v733_v26, %v728_v25 }
 0x2a8   :  { %v709_v29 = vpop.xlane.xlu0 %708  ;;  %v705_v33 = vpop.xlane.xlu1 %704 }
 0x2a9   :  { %983 = vrsqrt.f32 %v738_v27  ;;  %v742_v31 = vrot.slane %v709_v29, 2 }
 0x2ab   :  { %v748_v35 = vsel %vm747_vm13, %v705_v33, %v742_v31 }
 0x2ac   :  { %v716_v36 = vpop.xlane.xlu0 %715 }
 0x2b3   :  { %v984_v30 = vpop.eup %983 }
 0x2b4   :  { %v740_v32 = vmul.f32 %v984_v30, %v737_v28 }
 0x2b6   :  { %v745_v34 = vrot.slane %v740_v32, 2 }
 0x2b8   :  { %v750_v37 = vsel %vm749_vm14, %v748_v35, %v745_v34 }
 0x2b9   :  { %v752_v38 = vsel %vm751_vm15, %v750_v37, %v716_v36 }
 0x2ba   :  { %v754_v39 = vsel %vm753_vm0, %v752_v38, 0.0 }
 0x2bb   :  { %755 = vst [vmem:[%s1221_s5] sm:$0x3] %v754_v39 }

</bundles_post_ra>
